<compile_context>
chip_gen: v6e
topology: v6e:2x2x1
jax: 0.10.0
libtpu: 0.0.40
codegen_flags: <defaults>
</compile_context>

<pallas_src>
import jax
import jax.numpy as jnp
from jax.experimental import pallas as pl
from jax.experimental.pallas import tpu as pltpu

B, C_IN, H, W = 2, 4, 16, 16
HW = H * W
C_ENC = 64      # encoder output feature dim
D_DISC = 64     # discriminator output dim == Simclr_head input dim
HID = 64        # Simclr_head hidden1 / hidden2

# Row offsets inside the stacked weight operand (all multiples of 8 -> aligned
# sublane slices, no relayout on the static slices below).
_WD_END = 2 * C_ENC           # 128 : vstack(wd1, wd2)
_W1_END = _WD_END + D_DISC    # 192 : fc1 weight
_W2_END = _W1_END + HID       # 256 : fc2 weight


def augcon_eval_kernel(x_ref, w_enc_ref, w_stack_ref, b_stack_ref, out_ref):
    # ---- encoder (synthetic stand-in: 1x1 conv + ReLU + global avg pool) ----
    # TODO(synk): the real `encoder` is an injected nn.Module of unknown
    # architecture; a 1x1-conv + GAP stand-in producing a 64-d feature is used.
    # Both images and all batch elements fused into ONE 2-D MXU matmul.
    x = x_ref[...]                                            # (2B*HW, C_IN) bf16
    f = jnp.dot(x, w_enc_ref[...],
                preferred_element_type=jnp.float32)           # (2B*HW, C_ENC) f32
    f = jnp.maximum(f + b_stack_ref[0:1, :], 0.0)             # bias + ReLU
    # GAP per (image, batch) slot; rows are ordered [img1 b0, img1 b1,
    # img2 b0, img2 b1], each a block of HW pixel rows.  The 1/HW mean scale
    # is pre-folded into w_enc/b_enc, so a plain sum suffices.  The reshape
    # splits the sublane dim at a multiple-of-8 boundary -> no relayout.
    f_all = jnp.sum(f.reshape(2 * B, HW, C_ENC), axis=1)      # (2B, C_ENC) f32
    f_all = f_all.astype(jnp.bfloat16)

    # ---- discriminator (synthetic stand-in) --------------------------------
    # TODO(synk): the real `discriminator` is an injected nn.Module; modeled
    # as Linear(concat(f1, f2)) + ReLU, fused into a single K=128 dot.
    d_in = jnp.concatenate([f_all[0:B, :], f_all[B:2 * B, :]],
                           axis=1)                            # (B, 2*C_ENC) bf16
    d = jnp.dot(d_in, w_stack_ref[0:_WD_END, :],
                preferred_element_type=jnp.float32)           # (B, D_DISC) f32
    d = jnp.maximum(d + b_stack_ref[1:2, :], 0.0).astype(jnp.bfloat16)

    # ---- Simclr_head: fc1 -> ReLU -> fc2 (exact semantics) -----------------
    h = (jnp.dot(d, w_stack_ref[_WD_END:_W1_END, :],
                 preferred_element_type=jnp.float32)
         + b_stack_ref[2:3, :])
    h = jnp.maximum(h, 0.0).astype(jnp.bfloat16)
    out_ref[...] = (jnp.dot(h, w_stack_ref[_W1_END:_W2_END, :],
                            preferred_element_type=jnp.float32)
                    + b_stack_ref[3:4, :])


def pack_params(raw):
    """Pack 9 torch-layout params into 3 kernel operands (fewer DMAs).

    Also folds the GAP 1/HW scale into the encoder weight & bias (valid
    because ReLU(x)/HW == ReLU(x/HW) for the positive scale 1/HW), so the
    in-kernel pool is a pure sum.
    """
    w_enc, b_enc, wd1, wd2, bd, w1, b1, w2, b2 = raw
    inv_hw = jnp.float32(1.0 / HW)
    w_enc_k = (w_enc * inv_hw).astype(jnp.bfloat16)                        # (C_IN, C_ENC)
    w_stack = jnp.concatenate([wd1, wd2, w1, w2], axis=0).astype(jnp.bfloat16)  # (256, HID)
    b_stack = jnp.stack([b_enc * inv_hw, bd, b1, b2], axis=0).astype(jnp.float32)  # (4, HID)
    return w_enc_k, w_stack, b_stack


@jax.jit
def augcon_eval_forward(img1_nchw, img2_nchw, w_enc, w_stack, b_stack):
    # Stack both images along batch, NCHW -> (pixels, channels).  ~16 KiB of
    # XLA prep (negligible) yields one fused, statically shaped activation.
    imgs = jnp.concatenate([img1_nchw, img2_nchw], axis=0)            # (2B, C, H, W)
    x_all = (jnp.transpose(imgs, (0, 2, 3, 1))
             .reshape(2 * B * HW, C_IN)
             .astype(jnp.bfloat16))                                    # (2B*HW, C_IN)

    vmem = pl.BlockSpec(memory_space=pltpu.MemorySpace.VMEM)
    return pl.pallas_call(
        augcon_eval_kernel,
        out_shape=jax.ShapeDtypeStruct((B, HID), jnp.float32),
        in_specs=[vmem, vmem, vmem, vmem],
        out_specs=vmem,
    )(x_all, w_enc, w_stack, b_stack)


def make_params():
    key = jax.random.PRNGKey(42)
    ks = jax.random.split(key, 9)
    scale = 0.05
    w_enc = scale * jax.random.normal(ks[0], (C_IN, C_ENC), jnp.float32)
    b_enc = scale * jax.random.normal(ks[1], (C_ENC,), jnp.float32)
    # discriminator: Linear(2*C_ENC -> D_DISC), kept as two (C_ENC, D_DISC) halves
    wd1 = scale * jax.random.normal(ks[2], (C_ENC, D_DISC), jnp.float32)
    wd2 = scale * jax.random.normal(ks[3], (C_ENC, D_DISC), jnp.float32)
    bd = scale * jax.random.normal(ks[4], (D_DISC,), jnp.float32)
    # Simclr_head: fc1 (64->64), fc2 (64->64); weights stored as (in, out) = torch_W.T
    w1 = scale * jax.random.normal(ks[5], (D_DISC, HID), jnp.float32)
    b1 = scale * jax.random.normal(ks[6], (HID,), jnp.float32)
    w2 = scale * jax.random.normal(ks[7], (HID, HID), jnp.float32)
    b2 = scale * jax.random.normal(ks[8], (HID,), jnp.float32)
    return (w_enc, b_enc, wd1, wd2, bd, w1, b1, w2, b2)


def reference_forward(img1, img2, raw):
    """Pure-JAX f32 reference (same synthetic encoder/discriminator)."""
    w_enc, b_enc, wd1, wd2, bd, w1, b1, w2, b2 = raw

    def encoder(img):
        x = jnp.transpose(img, (0, 2, 3, 1)).reshape(B, HW, C_IN)
        f = jnp.maximum(jnp.einsum('bpc,cd->bpd', x, w_enc) + b_enc, 0.0)
        return jnp.mean(f, axis=1)                                    # (B, C_ENC)

    f1, f2 = encoder(img1), encoder(img2)
    d = jnp.maximum(f1 @ wd1 + f2 @ wd2 + bd, 0.0)
    h = jnp.maximum(d @ w1 + b1, 0.0)
    return h @ w2 + b2


if __name__ == "__main__":
    key = jax.random.PRNGKey(0)
    k1, k2 = jax.random.split(key)
    img1 = jax.random.normal(k1, (B, C_IN, H, W), jnp.float32)   # NCHW
    img2 = jax.random.normal(k2, (B, C_IN, H, W), jnp.float32)   # NCHW

    raw = make_params()
    w_enc, w_stack, b_stack = pack_params(raw)

    out = augcon_eval_forward(img1, img2, w_enc, w_stack, b_stack)
    out = jax.block_until_ready(out)

    ref = reference_forward(img1, img2, raw)
    assert out.shape == (B, HID)
    assert bool(jnp.all(jnp.isfinite(out)))
    # bf16 MXU path vs f32 reference -> generous tolerance.
    assert bool(jnp.allclose(out, ref, rtol=1e-1, atol=1e-2))
    print("KERNEL_OK")
</pallas_src>

<mosaic_0001>
module attributes {stable_mosaic.version = 11 : i64} {
  func.func @augcon_eval_kernel(%arg0: memref<1024x4xbf16, #tpu.memory_space<vmem>>, %arg1: memref<4x64xbf16, #tpu.memory_space<vmem>>, %arg2: memref<256x64xbf16, #tpu.memory_space<vmem>>, %arg3: memref<4x64xf32, #tpu.memory_space<vmem>>, %arg4: memref<2x64xf32, #tpu.memory_space<vmem>>) attributes {dimension_semantics = [], scalar_prefetch = 0 : i64, scratch_operands = 0 : i64, tpu.core_type = #tpu.core_type<tc>} {
    %c0 = arith.constant 0 : index
    %c0_0 = arith.constant 0 : index
    %0 = vector.load %arg0[%c0, %c0_0] : memref<1024x4xbf16, #tpu.memory_space<vmem>>, vector<1024x4xbf16>
    %c0_1 = arith.constant 0 : index
    %c0_2 = arith.constant 0 : index
    %1 = vector.load %arg1[%c0_1, %c0_2] : memref<4x64xbf16, #tpu.memory_space<vmem>>, vector<4x64xbf16>
    %cst = arith.constant dense<0.000000e+00> : vector<1024x64xf32>
    %2 = tpu.matmul %0, %1, %cst {dimension_numbers = #tpu.dot_dimension_numbers<[1], [0], [0], [1], [0, 0, 1, 1], [], []>} : vector<1024x4xbf16>, vector<4x64xbf16>, vector<1024x64xf32> -> vector<1024x64xf32>
    %c0_3 = arith.constant 0 : index
    %c0_4 = arith.constant 0 : index
    %3 = vector.load %arg3[%c0_3, %c0_4] : memref<4x64xf32, #tpu.memory_space<vmem>>, vector<1x64xf32>
    %4 = vector.broadcast %3 : vector<1x64xf32> to vector<1024x64xf32>
    %5 = arith.addf %2, %4 : vector<1024x64xf32>
    %cst_5 = arith.constant 0.000000e+00 : f32
    %6 = vector.broadcast %cst_5 : f32 to vector<1024x64xf32>
    %7 = arith.maximumf %5, %6 : vector<1024x64xf32>
    %8 = vector.shape_cast %7 : vector<1024x64xf32> to vector<4x256x64xf32>
    %cst_6 = arith.constant dense<0.000000e+00> : vector<4x64xf32>
    %9 = vector.multi_reduction <add>, %8, %cst_6 [1] : vector<4x256x64xf32> to vector<4x64xf32>
    %10 = arith.truncf %9 : vector<4x64xf32> to vector<4x64xbf16>
    %11 = vector.extract_strided_slice %10 {offsets = [0, 0], sizes = [2, 64], strides = [1, 1]} : vector<4x64xbf16> to vector<2x64xbf16>
    %12 = vector.extract_strided_slice %10 {offsets = [2, 0], sizes = [2, 64], strides = [1, 1]} : vector<4x64xbf16> to vector<2x64xbf16>
    %13 = tpu.concatenate %11, %12 in 1 : vector<2x64xbf16>, vector<2x64xbf16> -> vector<2x128xbf16>
    %c0_7 = arith.constant 0 : index
    %c0_8 = arith.constant 0 : index
    %14 = vector.load %arg2[%c0_7, %c0_8] : memref<256x64xbf16, #tpu.memory_space<vmem>>, vector<128x64xbf16>
    %cst_9 = arith.constant dense<0.000000e+00> : vector<2x64xf32>
    %15 = tpu.matmul %13, %14, %cst_9 {dimension_numbers = #tpu.dot_dimension_numbers<[1], [0], [0], [1], [0, 0, 1, 1], [], []>} : vector<2x128xbf16>, vector<128x64xbf16>, vector<2x64xf32> -> vector<2x64xf32>
    %c1 = arith.constant 1 : index
    %c0_10 = arith.constant 0 : index
    %16 = vector.load %arg3[%c1, %c0_10] : memref<4x64xf32, #tpu.memory_space<vmem>>, vector<1x64xf32>
    %17 = vector.broadcast %16 : vector<1x64xf32> to vector<2x64xf32>
    %18 = arith.addf %15, %17 : vector<2x64xf32>
    %cst_11 = arith.constant 0.000000e+00 : f32
    %19 = vector.broadcast %cst_11 : f32 to vector<2x64xf32>
    %20 = arith.maximumf %18, %19 : vector<2x64xf32>
    %21 = arith.truncf %20 : vector<2x64xf32> to vector<2x64xbf16>
    %c128 = arith.constant 128 : index
    %c0_12 = arith.constant 0 : index
    %22 = vector.load %arg2[%c128, %c0_12] : memref<256x64xbf16, #tpu.memory_space<vmem>>, vector<64x64xbf16>
    %cst_13 = arith.constant dense<0.000000e+00> : vector<2x64xf32>
    %23 = tpu.matmul %21, %22, %cst_13 {dimension_numbers = #tpu.dot_dimension_numbers<[1], [0], [0], [1], [0, 0, 1, 1], [], []>} : vector<2x64xbf16>, vector<64x64xbf16>, vector<2x64xf32> -> vector<2x64xf32>
    %c2 = arith.constant 2 : index
    %c0_14 = arith.constant 0 : index
    %24 = vector.load %arg3[%c2, %c0_14] : memref<4x64xf32, #tpu.memory_space<vmem>>, vector<1x64xf32>
    %25 = vector.broadcast %24 : vector<1x64xf32> to vector<2x64xf32>
    %26 = arith.addf %23, %25 : vector<2x64xf32>
    %cst_15 = arith.constant 0.000000e+00 : f32
    %27 = vector.broadcast %cst_15 : f32 to vector<2x64xf32>
    %28 = arith.maximumf %26, %27 : vector<2x64xf32>
    %29 = arith.truncf %28 : vector<2x64xf32> to vector<2x64xbf16>
    %c192 = arith.constant 192 : index
    %c0_16 = arith.constant 0 : index
    %30 = vector.load %arg2[%c192, %c0_16] : memref<256x64xbf16, #tpu.memory_space<vmem>>, vector<64x64xbf16>
    %cst_17 = arith.constant dense<0.000000e+00> : vector<2x64xf32>
    %31 = tpu.matmul %29, %30, %cst_17 {dimension_numbers = #tpu.dot_dimension_numbers<[1], [0], [0], [1], [0, 0, 1, 1], [], []>} : vector<2x64xbf16>, vector<64x64xbf16>, vector<2x64xf32> -> vector<2x64xf32>
    %c3 = arith.constant 3 : index
    %c0_18 = arith.constant 0 : index
    %32 = vector.load %arg3[%c3, %c0_18] : memref<4x64xf32, #tpu.memory_space<vmem>>, vector<1x64xf32>
    %33 = vector.broadcast %32 : vector<1x64xf32> to vector<2x64xf32>
    %34 = arith.addf %31, %33 : vector<2x64xf32>
    %c0_19 = arith.constant 0 : index
    %c0_20 = arith.constant 0 : index
    %35 = vector.load %arg4[%c0_19, %c0_20] : memref<2x64xf32, #tpu.memory_space<vmem>>, vector<2x64xf32>
    tpu.vector_store %arg4[%c0_19, %c0_20], %34 {strides = array<i32>} : memref<2x64xf32, #tpu.memory_space<vmem>>, vector<2x64xf32>,
    return
  }
}

</mosaic_0001>

<bundles_post_ra>
// kernel: augcon_eval_forward.1
= control target key start
LH: loop header
LB: loop body
LE: loop exit
PB: predicated region body
PF: predicated region fallthrough
CT: control target
= control target key end

     0   :  { %vm666_vm0 = vcmask 1041408   ;;  %vm473_vm1 = vcmask 31744   ;;  %s3181_s0 = inlined_call_operand.vmem [shape: bf16[1024,4], index: 0, kind: input, shape index: {}]   ;;  %s3182_s1 = inlined_call_operand.vmem [shape: bf16[4,64], index: 1, kind: input, shape index: {}]   ;;  %s3183_s2 = inlined_call_operand.vmem [shape: bf16[256,64], index: 2, kind: input, shape index: {}]   ;;  %s3184_s3 = inlined_call_operand.vmem [shape: f32[4,64], index: 3, kind: input, shape index: {}]   ;;  %s3185_s4 = inlined_call_operand.hbm [shape: f32[2,64], index: 4, kind: output, shape index: {}]  }
   0x1   :  { %v147_v0 = vld [vmem:[%s3182_s1] sm:$0x3]  ;;  %v2349_v3 = vld [vmem:[%s3181_s0 + $0x8] sm:$0xff]   ;;  %v2350_v4 = vld [vmem:[%s3181_s0 + $0x10] sm:$0xff]  }
   0x2   :  { %v2348_v1 = vld [vmem:[%s3181_s0] sm:$0xff]   ;;  %2342 = vmatprep.subr.msk.bf16.mxu0 %vm666_vm0, %v147_v0  ;;  %v668_v2 = vsel %vm666_vm0, %v147_v0, 0  ;;  %2343 = vmatprep.subr.msk.bf16.mxu1 %vm666_vm0, %v147_v0  ;;  %v2351_v5 = vld [vmem:[%s3181_s0 + $0x18] sm:$0xff]   ;;  %v2353_v7 = vld [vmem:[%s3181_s0 + $0x28] sm:$0xff]  }
   0x3   :  { %2167 = vmatpush3.bf16.msra.mxu0 %v668_v2  ;;  %2168 = vmatprep.mubr.msk.bf16.mxu0 %vm473_vm1, %v2348_v1  ;;  %v2352_v6 = vld [vmem:[%s3181_s0 + $0x20] sm:$0xff]   ;;  %v2354_v8 = vld [vmem:[%s3181_s0 + $0x30] sm:$0xff]   ;;  %v2369_v10 = vld [vmem:[%s3181_s0 + $0x138] sm:$0xff]  }
   0x4   :  { %2341 = vmatpush3.bf16.msra.mxu1 %v668_v2  ;;  %v2367_v9 = vld [vmem:[%s3181_s0 + $0x130] sm:$0xff]   ;;  %v2371_v11 = vld [vmem:[%s3181_s0 + $0x140] sm:$0xff]   ;;  %v2355_v12 = vld [vmem:[%s3181_s0 + $0x38] sm:$0xff]  }
   0x5   :  { %2244 = vmatprep.mubr.msk.bf16.mxu1 %vm473_vm1, %v2367_v9  ;;  %v2356_v13 = vld [vmem:[%s3181_s0 + $0x40] sm:$0xff]   ;;  %v2373_v14 = vld [vmem:[%s3181_s0 + $0x148] sm:$0xff]   ;;  %v2375_v15 = vld [vmem:[%s3181_s0 + $0x150] sm:$0xff]  }
   0x6   :  { %2169 = vmatmul.mubr.msk.bf16.vlgmr.msra.gmra.mxu0 %vm473_vm1, %v2349_v3  ;;  %v2357_v16 = vld [vmem:[%s3181_s0 + $0x48] sm:$0xff]   ;;  %v2358_v17 = vld [vmem:[%s3181_s0 + $0x50] sm:$0xff]   ;;  %v2377_v18 = vld [vmem:[%s3181_s0 + $0x158] sm:$0xff]  }
   0x7   :  { %2172 = vmatprep.mubr.msk.bf16.mxu0 %vm473_vm1, %v2350_v4  ;;  %2245 = vmatmul.mubr.msk.bf16.vlgmr.msra.gmra.mxu1 %vm473_vm1, %v2369_v10  ;;  %v2379_v19 = vld [vmem:[%s3181_s0 + $0x160] sm:$0xff]   ;;  %v2359_v20 = vld [vmem:[%s3181_s0 + $0x58] sm:$0xff]   ;;  %v2381_v22 = vld [vmem:[%s3181_s0 + $0x168] sm:$0xff]  }
   0x8   :  { %2248 = vmatprep.mubr.msk.bf16.mxu1 %vm473_vm1, %v2371_v11  ;;  %v2360_v21 = vld [vmem:[%s3181_s0 + $0x60] sm:$0xff]   ;;  %v2383_v23 = vld [vmem:[%s3181_s0 + $0x170] sm:$0xff]   ;;  %v2361_v24 = vld [vmem:[%s3181_s0 + $0x68] sm:$0xff]  }
   0x9   :  { %v2362_v25 = vld [vmem:[%s3181_s0 + $0x70] sm:$0xff]   ;;  %v2385_v26 = vld [vmem:[%s3181_s0 + $0x178] sm:$0xff]   ;;  %v2387_v27 = vld [vmem:[%s3181_s0 + $0x180] sm:$0xff]  }
   0xa   :  { %v2363_v28 = vld [vmem:[%s3181_s0 + $0x78] sm:$0xff]   ;;  %v2364_v29 = vld [vmem:[%s3181_s0 + $0x80] sm:$0xff]   ;;  %v2389_v30 = vld [vmem:[%s3181_s0 + $0x188] sm:$0xff]  }
   0xb   :  { %v2391_v31 = vld [vmem:[%s3181_s0 + $0x190] sm:$0xff]   ;;  %v2365_v32 = vld [vmem:[%s3181_s0 + $0x88] sm:$0xff]   ;;  %v2393_v34 = vld [vmem:[%s3181_s0 + $0x198] sm:$0xff]  }
   0xc   :  { %v2366_v33 = vld [vmem:[%s3181_s0 + $0x90] sm:$0xff]   ;;  %v2395_v35 = vld [vmem:[%s3181_s0 + $0x1a0] sm:$0xff]   ;;  %v2368_v36 = vld [vmem:[%s3181_s0 + $0x98] sm:$0xff]  }
   0xd   :  { %v2370_v37 = vld [vmem:[%s3181_s0 + $0xa0] sm:$0xff]   ;;  %v2397_v38 = vld [vmem:[%s3181_s0 + $0x1a8] sm:$0xff]  }
   0xe   :  { %2173 = vmatmul.mubr.msk.bf16.gmra.mxu0 %vm473_vm1, %v2351_v5 }
   0xf   :  { %2176 = vmatprep.mubr.msk.bf16.mxu0 %vm473_vm1, %v2352_v6  ;;  %2249 = vmatmul.mubr.msk.bf16.gmra.mxu1 %vm473_vm1, %v2373_v14 }
  0x10   :  { %2252 = vmatprep.mubr.msk.bf16.mxu1 %vm473_vm1, %v2375_v15 }
  0x16   :  { %2177 = vmatmul.mubr.msk.bf16.gmra.mxu0 %vm473_vm1, %v2353_v7 }
  0x17   :  { %2180 = vmatprep.mubr.msk.bf16.mxu0 %vm473_vm1, %v2354_v8  ;;  %2253 = vmatmul.mubr.msk.bf16.gmra.mxu1 %vm473_vm1, %v2377_v18 }
  0x18   :  { %2256 = vmatprep.mubr.msk.bf16.mxu1 %vm473_vm1, %v2379_v19 }
  0x1e   :  { %2181 = vmatmul.mubr.msk.bf16.gmra.mxu0 %vm473_vm1, %v2355_v12 }
  0x1f   :  { %2184 = vmatprep.mubr.msk.bf16.mxu0 %vm473_vm1, %v2356_v13  ;;  %2257 = vmatmul.mubr.msk.bf16.gmra.mxu1 %vm473_vm1, %v2381_v22 }
  0x20   :  { %2260 = vmatprep.mubr.msk.bf16.mxu1 %vm473_vm1, %v2383_v23 }
  0x26   :  { %2185 = vmatmul.mubr.msk.bf16.gmra.mxu0 %vm473_vm1, %v2357_v16 }
  0x27   :  { %2188 = vmatprep.mubr.msk.bf16.mxu0 %vm473_vm1, %v2358_v17  ;;  %2261 = vmatmul.mubr.msk.bf16.gmra.mxu1 %vm473_vm1, %v2385_v26 }
  0x28   :  { %2264 = vmatprep.mubr.msk.bf16.mxu1 %vm473_vm1, %v2387_v27 }
  0x2e   :  { %2189 = vmatmul.mubr.msk.bf16.gmra.mxu0 %vm473_vm1, %v2359_v20 }
  0x2f   :  { %2192 = vmatprep.mubr.msk.bf16.mxu0 %vm473_vm1, %v2360_v21  ;;  %2265 = vmatmul.mubr.msk.bf16.gmra.mxu1 %vm473_vm1, %v2389_v30 }
  0x30   :  { %2268 = vmatprep.mubr.msk.bf16.mxu1 %vm473_vm1, %v2391_v31 }
  0x36   :  { %2193 = vmatmul.mubr.msk.bf16.gmra.mxu0 %vm473_vm1, %v2361_v24 }
  0x37   :  { %2196 = vmatprep.mubr.msk.bf16.mxu0 %vm473_vm1, %v2362_v25  ;;  %2269 = vmatmul.mubr.msk.bf16.gmra.mxu1 %vm473_vm1, %v2393_v34 }
  0x38   :  { %2272 = vmatprep.mubr.msk.bf16.mxu1 %vm473_vm1, %v2395_v35 }
  0x3e   :  { %2197 = vmatmul.mubr.msk.bf16.gmra.mxu0 %vm473_vm1, %v2363_v28 }
  0x3f   :  { %2200 = vmatprep.mubr.msk.bf16.mxu0 %vm473_vm1, %v2364_v29 }
  0x46   :  { %2201 = vmatmul.mubr.msk.bf16.gmra.mxu0 %vm473_vm1, %v2365_v32 }
  0x47   :  { %2204 = vmatprep.mubr.msk.bf16.mxu0 %vm473_vm1, %v2366_v33 }
  0x48   :  { %9 = vsyncpa [#allocation3], 0  ;;  %v2399_v39 = vld [vmem:[%s3181_s0 + $0x1b0] sm:$0xff]   ;;  %2273 = vmatmul.mubr.msk.bf16.gmra.mxu1 %vm473_vm1, %v2397_v38  ;;  %v2372_v40 = vld [vmem:[%s3181_s0 + $0xa8] sm:$0xff]   ;;  %vm1343_vm2 = vcmask 523264   ;;  %vm1628_vm3 = vcmask 1041409  }
  0x49   :  { %2276 = vmatprep.mubr.msk.bf16.mxu1 %vm473_vm1, %v2399_v39  ;;  %v2374_v41 = vld [vmem:[%s3181_s0 + $0xb0] sm:$0xff]   ;;  %v2401_v42 = vld [vmem:[%s3181_s0 + $0x1b8] sm:$0xff]   ;;  %v2403_v43 = vld [vmem:[%s3181_s0 + $0x1c0] sm:$0xff]   ;;  %vm2452_vm4 = vmmov 0   ;;  %s2453_s28 = smov 64   ;;  %vm1916_vm5 = vcmask 517120  }
  0x4a   :  { %v2376_v44 = vld [vmem:[%s3181_s0 + $0xb8] sm:$0xff]   ;;  %v2378_v45 = vld [vmem:[%s3181_s0 + $0xc0] sm:$0xff]   ;;  %v2405_v46 = vld [vmem:[%s3181_s0 + $0x1c8] sm:$0xff]  }
  0x4b   :  { %v2406_v47 = vld [vmem:[%s3181_s0 + $0x1d0] sm:$0xff]   ;;  %v2380_v48 = vld [vmem:[%s3181_s0 + $0xc8] sm:$0xff]   ;;  %v2407_v50 = vld [vmem:[%s3181_s0 + $0x1d8] sm:$0xff]  }
  0x4c   :  { %v2382_v49 = vld [vmem:[%s3181_s0 + $0xd0] sm:$0xff]   ;;  %v2408_v51 = vld [vmem:[%s3181_s0 + $0x1e0] sm:$0xff]   ;;  %v2384_v52 = vld [vmem:[%s3181_s0 + $0xd8] sm:$0xff]  }
  0x4d   :  { %v2386_v53 = vld [vmem:[%s3181_s0 + $0xe0] sm:$0xff]   ;;  %v2409_v54 = vld [vmem:[%s3181_s0 + $0x1e8] sm:$0xff]   ;;  %v2410_v55 = vld [vmem:[%s3181_s0 + $0x1f0] sm:$0xff]  }
  0x4e   :  { %2205 = vmatmul.mubr.msk.bf16.gmra.mxu0 %vm473_vm1, %v2368_v36  ;;  %v2388_v56 = vld [vmem:[%s3181_s0 + $0xe8] sm:$0xff]   ;;  %v2390_v57 = vld [vmem:[%s3181_s0 + $0xf0] sm:$0xff]   ;;  %v2411_v58 = vld [vmem:[%s3181_s0 + $0x1f8] sm:$0xff]  }
  0x4f   :  { %2208 = vmatprep.mubr.msk.bf16.mxu0 %vm473_vm1, %v2370_v37  ;;  %v2392_v59 = vld [vmem:[%s3181_s0 + $0xf8] sm:$0xff]   ;;  %v2394_v60 = vld [vmem:[%s3181_s0 + $0x100] sm:$0xff]   ;;  %v2396_v61 = vld [vmem:[%s3181_s0 + $0x108] sm:$0xff]  }
  0x50   :  { %2277 = vmatmul.mubr.msk.bf16.gmra.mxu1 %vm473_vm1, %v2401_v42  ;;  %v2398_v62 = vld [vmem:[%s3181_s0 + $0x110] sm:$0xff]   ;;  %v2400_v63 = vld [vmem:[%s3181_s0 + $0x118] sm:$0xff]   ;;  %v2402_v0 = vld [vmem:[%s3181_s0 + $0x120] sm:$0xff]  }
  0x51   :  { %2280 = vmatprep.mubr.msk.bf16.mxu1 %vm473_vm1, %v2403_v43  ;;  %v2404_v1 = vld [vmem:[%s3181_s0 + $0x128] sm:$0xff]   ;;  %v2742_v3 = vld [vmem:[%s3184_s3] ss:$0 sm:$0xff] }
  0x56   :  { %2209 = vmatmul.mubr.msk.bf16.gmra.mxu0 %vm473_vm1, %v2372_v40 }
  0x57   :  { %2212 = vmatprep.mubr.msk.bf16.mxu0 %vm473_vm1, %v2374_v41 }
  0x58   :  { %2281 = vmatmul.mubr.msk.bf16.gmra.mxu1 %vm473_vm1, %v2405_v46 }
  0x59   :  { %2284 = vmatprep.mubr.msk.bf16.mxu1 %vm473_vm1, %v2406_v47 }
  0x5e   :  { %2213 = vmatmul.mubr.msk.bf16.gmra.mxu0 %vm473_vm1, %v2376_v44 }
  0x5f   :  { %2216 = vmatprep.mubr.msk.bf16.mxu0 %vm473_vm1, %v2378_v45 }
  0x60   :  { %2285 = vmatmul.mubr.msk.bf16.gmra.mxu1 %vm473_vm1, %v2407_v50 }
  0x61   :  { %2288 = vmatprep.mubr.msk.bf16.mxu1 %vm473_vm1, %v2408_v51 }
  0x66   :  { %2217 = vmatmul.mubr.msk.bf16.gmra.mxu0 %vm473_vm1, %v2380_v48 }
  0x67   :  { %2220 = vmatprep.mubr.msk.bf16.mxu0 %vm473_vm1, %v2382_v49 }
  0x68   :  { %2289 = vmatmul.mubr.msk.bf16.gmra.mxu1 %vm473_vm1, %v2409_v54 }
  0x69   :  { %2292 = vmatprep.mubr.msk.bf16.mxu1 %vm473_vm1, %v2410_v55 }
  0x6e   :  { %2221 = vmatmul.mubr.msk.bf16.gmra.mxu0 %vm473_vm1, %v2384_v52 }
  0x6f   :  { %2224 = vmatprep.mubr.msk.bf16.mxu0 %vm473_vm1, %v2386_v53 }
  0x70   :  { %2293 = vmatmul.mubr.msk.bf16.gmra.mxu1 %vm473_vm1, %v2411_v58 }
  0x76   :  { %2225 = vmatmul.mubr.msk.bf16.gmra.mxu0 %vm473_vm1, %v2388_v56 }
  0x77   :  { %2228 = vmatprep.mubr.msk.bf16.mxu0 %vm473_vm1, %v2390_v57 }
  0x7e   :  { %2229 = vmatmul.mubr.msk.bf16.gmra.mxu0 %vm473_vm1, %v2392_v59 }
  0x7f   :  { %2232 = vmatprep.mubr.msk.bf16.mxu0 %vm473_vm1, %v2394_v60 }
  0x86   :  { %2233 = vmatmul.mubr.msk.bf16.gmra.mxu0 %vm473_vm1, %v2396_v61 }
  0x87   :  { %2236 = vmatprep.mubr.msk.bf16.mxu0 %vm473_vm1, %v2398_v62 }
  0x8e   :  { %2237 = vmatmul.mubr.msk.bf16.gmra.mxu0 %vm473_vm1, %v2400_v63 }
  0x8f   :  { %2240 = vmatprep.mubr.msk.bf16.mxu0 %vm473_vm1, %v2402_v0 }
  0x96   :  { %2241 = vmatmul.mubr.msk.bf16.gmra.mxu0 %vm473_vm1, %v2404_v1 }
  0xc6   :  { %v2170_v2 = vpop.f32.mrf.mxu0 }
  0xc7   :  { %v713_v7 = vadd.f32 %v2170_v2, %v2742_v3  ;;  %v2759_v40 = vpop.f32.mrf.mxu1 }
  0xc8   :  { %v704_v4 = vpop.f32.mrf.mxu0 }
  0xc9   :  { %v705_v5 = vadd.f32 %v2742_v3, %v704_v4  ;;  %v1217_v13 = vmax.f32 %v713_v7, 0.0  ;;  %v2763_v46 = vpop.f32.mrf.mxu1 }
  0xca   :  { %v2171_v6 = vpop.f32.mrf.mxu0 }
  0xcb   :  { %v1215_v9 = vmax.f32 %v705_v5, 0.0  ;;  %v716_v10 = vadd.f32 %v2171_v6, %v2742_v3  ;;  %v1347_v22 = vsel %vm1343_vm2, %v1217_v13, 0.0  ;;  %v2768_v52 = vpop.f32.mrf.mxu1 }
  0xcc   :  { %v707_v8 = vpop.f32.mrf.mxu0 }
  0xcd   :  { %v708_v11 = vadd.f32 %v2742_v3, %v707_v8  ;;  %v1344_v16 = vsel %vm1343_vm2, %v1215_v9, 0.0  ;;  %v1218_v17 = vmax.f32 %v716_v10, 0.0  ;;  %v2771_v58 = vpop.f32.mrf.mxu1 }
  0xce   :  { %v2174_v12 = vpop.f32.mrf.mxu0 }
  0xcf   :  { %v1216_v14 = vmax.f32 %v708_v11, 0.0  ;;  %v729_v23 = vadd.f32 %v2174_v12, %v2742_v3  ;;  %v1349_v27 = vsel %vm1343_vm2, %v1218_v17, 0.0  ;;  %v2775_v0 = vpop.f32.mrf.mxu1 }
  0xd0   :  { %v720_v15 = vpop.f32.mrf.mxu0 }
  0xd1   :  { %v1345_v18 = vsel %vm1343_vm2, %v1216_v14, 0.0  ;;  %v721_v19 = vadd.f32 %v2742_v3, %v720_v15  ;;  %v1221_v32 = vmax.f32 %v729_v23, 0.0  ;;  %v2779_v7 = vpop.f32.mrf.mxu1 }
  0xd2   :  { %v1346_v20 = vadd.f32 %v1345_v18, %v1344_v16  ;;  %v2175_v21 = vpop.f32.mrf.mxu0 }
  0xd3   :  { %v1219_v24 = vmax.f32 %v721_v19, 0.0  ;;  %v732_v28 = vadd.f32 %v2175_v21, %v2742_v3  ;;  %v1355_v43 = vsel %vm1343_vm2, %v1221_v32, 0.0  ;;  %v2784_v13 = vpop.f32.mrf.mxu1 }
  0xd4   :  { %v1348_v25 = vadd.f32 %v1347_v22, %v1346_v20  ;;  %v723_v26 = vpop.f32.mrf.mxu0 }
  0xd5   :  { %v724_v29 = vadd.f32 %v2742_v3, %v723_v26  ;;  %v1351_v33 = vsel %vm1343_vm2, %v1219_v24, 0.0  ;;  %v1222_v37 = vmax.f32 %v732_v28, 0.0  ;;  %v2787_v19 = vpop.f32.mrf.mxu1 }
  0xd6   :  { %v1350_v30 = vadd.f32 %v1349_v27, %v1348_v25  ;;  %v2178_v31 = vpop.f32.mrf.mxu0 }
  0xd7   :  { %v1220_v34 = vmax.f32 %v724_v29, 0.0  ;;  %v745_v44 = vadd.f32 %v2178_v31, %v2742_v3  ;;  %v1357_v49 = vsel %vm1343_vm2, %v1222_v37, 0.0  ;;  %v2791_v25 = vpop.f32.mrf.mxu1 }
  0xd8   :  { %v1352_v35 = vadd.f32 %v1351_v33, %v1350_v30  ;;  %v736_v36 = vpop.f32.mrf.mxu0 }
  0xd9   :  { %v1353_v38 = vsel %vm1343_vm2, %v1220_v34, 0.0  ;;  %v737_v39 = vadd.f32 %v2742_v3, %v736_v36  ;;  %v1225_v55 = vmax.f32 %v745_v44, 0.0  ;;  %v2795_v31 = vpop.f32.mrf.mxu1 }
  0xda   :  { %v1354_v41 = vadd.f32 %v1353_v38, %v1352_v35  ;;  %v2179_v42 = vpop.f32.mrf.mxu0 }
  0xdb   :  { %v1223_v45 = vmax.f32 %v737_v39, 0.0  ;;  %v748_v50 = vadd.f32 %v2179_v42, %v2742_v3  ;;  %v1363_v4 = vsel %vm1343_vm2, %v1225_v55, 0.0  ;;  %v2800_v37 = vpop.f32.mrf.mxu1 }
  0xdc   :  { %v1356_v47 = vadd.f32 %v1355_v43, %v1354_v41  ;;  %v739_v48 = vpop.f32.mrf.mxu0 }
  0xdd   :  { %v740_v51 = vadd.f32 %v2742_v3, %v739_v48  ;;  %v1359_v56 = vsel %vm1343_vm2, %v1223_v45, 0.0  ;;  %v1226_v61 = vmax.f32 %v748_v50, 0.0  ;;  %v2803_v44 = vpop.f32.mrf.mxu1 }
  0xde   :  { %v1358_v53 = vadd.f32 %v1357_v49, %v1356_v47  ;;  %v2182_v54 = vpop.f32.mrf.mxu0 }
  0xdf   :  { %v1224_v57 = vmax.f32 %v740_v51, 0.0  ;;  %v761_v5 = vadd.f32 %v2182_v54, %v2742_v3  ;;  %v1365_v10 = vsel %vm1343_vm2, %v1226_v61, 0.0  ;;  %v2807_v51 = vpop.f32.mrf.mxu1 }
  0xe0   :  { %v1360_v59 = vadd.f32 %v1359_v56, %v1358_v53  ;;  %v752_v60 = vpop.f32.mrf.mxu0 }
  0xe1   :  { %v1361_v62 = vsel %vm1343_vm2, %v1224_v57, 0.0  ;;  %v753_v63 = vadd.f32 %v2742_v3, %v752_v60  ;;  %v1229_v16 = vmax.f32 %v761_v5, 0.0 }
  0xe2   :  { %v1362_v1 = vadd.f32 %v1361_v62, %v1360_v59  ;;  %v2183_v2 = vpop.f32.mrf.mxu0  ;;  %v2811_v59 = vpop.f32.mrf.mxu1 }
  0xe3   :  { %v1227_v6 = vmax.f32 %v753_v63, 0.0  ;;  %v764_v11 = vadd.f32 %v2183_v2, %v2742_v3  ;;  %v1371_v28 = vsel %vm1343_vm2, %v1229_v16, 0.0 }
  0xe4   :  { %v1364_v8 = vadd.f32 %v1363_v4, %v1362_v1  ;;  %v755_v9 = vpop.f32.mrf.mxu0  ;;  %v2816_v2 = vpop.f32.mrf.mxu1 }
  0xe5   :  { %v756_v12 = vadd.f32 %v2742_v3, %v755_v9  ;;  %v1367_v17 = vsel %vm1343_vm2, %v1227_v6, 0.0  ;;  %v1230_v22 = vmax.f32 %v764_v11, 0.0 }
  0xe6   :  { %v1366_v14 = vadd.f32 %v1365_v10, %v1364_v8  ;;  %v2186_v15 = vpop.f32.mrf.mxu0  ;;  %v2819_v10 = vpop.f32.mrf.mxu1 }
  0xe7   :  { %v1228_v18 = vmax.f32 %v756_v12, 0.0  ;;  %v777_v29 = vadd.f32 %v2186_v15, %v2742_v3  ;;  %v1373_v34 = vsel %vm1343_vm2, %v1230_v22, 0.0 }
  0xe8   :  { %v1368_v20 = vadd.f32 %v1367_v17, %v1366_v14  ;;  %v768_v21 = vpop.f32.mrf.mxu0  ;;  %v2823_v17 = vpop.f32.mrf.mxu1 }
  0xe9   :  { %v1369_v23 = vsel %vm1343_vm2, %v1228_v18, 0.0  ;;  %v769_v24 = vadd.f32 %v2742_v3, %v768_v21  ;;  %v1233_v41 = vmax.f32 %v777_v29, 0.0 }
  0xea   :  { %v1370_v26 = vadd.f32 %v1369_v23, %v1368_v20  ;;  %v2187_v27 = vpop.f32.mrf.mxu0 }
  0xeb   :  { %v1231_v30 = vmax.f32 %v769_v24, 0.0  ;;  %v780_v35 = vadd.f32 %v2187_v27, %v2742_v3  ;;  %v1379_v55 = vsel %vm1343_vm2, %v1233_v41, 0.0  ;;  %v2827_v24 = vpop.f32.mrf.mxu1 }
  0xec   :  { %v1372_v32 = vadd.f32 %v1371_v28, %v1370_v26  ;;  %v771_v33 = vpop.f32.mrf.mxu0 }
  0xed   :  { %v772_v36 = vadd.f32 %v2742_v3, %v771_v33  ;;  %v1375_v42 = vsel %vm1343_vm2, %v1231_v30, 0.0  ;;  %v1234_v48 = vmax.f32 %v780_v35, 0.0 }
  0xee   :  { %v1374_v38 = vadd.f32 %v1373_v34, %v1372_v32  ;;  %v2190_v39 = vpop.f32.mrf.mxu0  ;;  %v2832_v32 = vpop.f32.mrf.mxu1 }
  0xef   :  { %v1232_v43 = vmax.f32 %v772_v36, 0.0  ;;  %v793_v56 = vadd.f32 %v2190_v39, %v2742_v3  ;;  %v1381_v62 = vsel %vm1343_vm2, %v1234_v48, 0.0 }
  0xf0   :  { %v1376_v45 = vadd.f32 %v1375_v42, %v1374_v38  ;;  %v784_v47 = vpop.f32.mrf.mxu0  ;;  %v2835_v39 = vpop.f32.mrf.mxu1 }
  0xf1   :  { %v1377_v49 = vsel %vm1343_vm2, %v1232_v43, 0.0  ;;  %v785_v50 = vadd.f32 %v2742_v3, %v784_v47  ;;  %v1237_v6 = vmax.f32 %v793_v56, 0.0 }
  0xf2   :  { %v1378_v53 = vadd.f32 %v1377_v49, %v1376_v45  ;;  %v2191_v54 = vpop.f32.mrf.mxu0  ;;  %v2266_v48 = vpop.f32.mrf.mxu1 }
  0xf3   :  { %v1235_v57 = vmax.f32 %v785_v50, 0.0  ;;  %v796_v63 = vadd.f32 %v2191_v54, %v2742_v3  ;;  %v1387_v21 = vsel %vm1343_vm2, %v1237_v6, 0.0  ;;  %v1097_v56 = vadd.f32 %v2266_v48, %v2742_v3 }
  0xf4   :  { %v1380_v60 = vadd.f32 %v1379_v55, %v1378_v53  ;;  %v787_v61 = vpop.f32.mrf.mxu0 }
  0xf5   :  { %v788_v1 = vadd.f32 %v2742_v3, %v787_v61  ;;  %v1383_v8 = vsel %vm1343_vm2, %v1235_v57, 0.0  ;;  %v1238_v14 = vmax.f32 %v796_v63, 0.0  ;;  %v1088_v57 = vpop.f32.mrf.mxu1 }
  0xf6   :  { %v1382_v4 = vadd.f32 %v1381_v62, %v1380_v60  ;;  %v2194_v5 = vpop.f32.mrf.mxu0  ;;  %v1089_v62 = vadd.f32 %v2742_v3, %v1088_v57 }
  0xf7   :  { %v1236_v9 = vmax.f32 %v788_v1, 0.0  ;;  %v809_v22 = vadd.f32 %v2194_v5, %v2742_v3  ;;  %v1389_v28 = vsel %vm1343_vm2, %v1238_v14, 0.0  ;;  %v2267_v5 = vpop.f32.mrf.mxu1 }
  0xf8   :  { %v1384_v11 = vadd.f32 %v1383_v8, %v1382_v4  ;;  %v800_v12 = vpop.f32.mrf.mxu0 }
  0xf9   :  { %v1385_v15 = vsel %vm1343_vm2, %v1236_v9, 0.0  ;;  %v801_v16 = vadd.f32 %v2742_v3, %v800_v12  ;;  %v1241_v35 = vmax.f32 %v809_v22, 0.0  ;;  %v1311_v9 = vmax.f32 %v1089_v62, 0.0 }
  0xfa   :  { %v1386_v18 = vadd.f32 %v1385_v15, %v1384_v11  ;;  %v2195_v20 = vpop.f32.mrf.mxu0  ;;  %v1100_v11 = vadd.f32 %v2267_v5, %v2742_v3 }
  0xfb   :  { %v1239_v23 = vmax.f32 %v801_v16, 0.0  ;;  %v812_v29 = vadd.f32 %v2195_v20, %v2742_v3  ;;  %v1395_v53 = vsel %vm1343_vm2, %v1241_v35, 0.0  ;;  %v1313_v16 = vmax.f32 %v1097_v56, 0.0 }
  0xfc   :  { %v1388_v26 = vadd.f32 %v1387_v21, %v1386_v18  ;;  %v803_v27 = vpop.f32.mrf.mxu0  ;;  %v1091_v18 = vpop.f32.mrf.mxu1 }
  0xfd   :  { %v804_v30 = vadd.f32 %v2742_v3, %v803_v27  ;;  %v1391_v36 = vsel %vm1343_vm2, %v1239_v23, 0.0  ;;  %v1242_v43 = vmax.f32 %v812_v29, 0.0  ;;  %v1092_v22 = vadd.f32 %v2742_v3, %v1091_v18 }
  0xfe   :  { %v1390_v33 = vadd.f32 %v1389_v28, %v1388_v26  ;;  %v2198_v34 = vpop.f32.mrf.mxu0  ;;  %v2270_v28 = vpop.f32.mrf.mxu1 }
  0xff   :  { %v1240_v38 = vmax.f32 %v804_v30, 0.0  ;;  %v825_v54 = vadd.f32 %v2198_v34, %v2742_v3  ;;  %v1397_v63 = vsel %vm1343_vm2, %v1242_v43, 0.0  ;;  %v1314_v34 = vmax.f32 %v1100_v11, 0.0 }
 0x100   :  { %v1392_v41 = vadd.f32 %v1391_v36, %v1390_v33  ;;  %v816_v42 = vpop.f32.mrf.mxu0  ;;  %v1551_v33 = vsel %vm1343_vm2, %v1311_v9, 0.0  ;;  %v1312_v35 = vmax.f32 %v1092_v22, 0.0  ;;  %v1113_v62 = vadd.f32 %v2270_v28, %v2742_v3 }
 0x101   :  { %v1393_v45 = vsel %vm1343_vm2, %v1240_v38, 0.0  ;;  %v817_v47 = vadd.f32 %v2742_v3, %v816_v42  ;;  %v1245_v12 = vmax.f32 %v825_v54, 0.0  ;;  %v1104_v42 = vpop.f32.mrf.mxu1 }
 0x102   :  { %v1394_v49 = vadd.f32 %v1393_v45, %v1392_v41  ;;  %v2199_v50 = vpop.f32.mrf.mxu0  ;;  %v1554_v41 = vsel %vm1343_vm2, %v1313_v16, 0.0  ;;  %v1552_v48 = vsel %vm1343_vm2, %v1312_v35, 0.0 }
 0x103   :  { %v1243_v55 = vmax.f32 %v817_v47, 0.0  ;;  %v828_v1 = vadd.f32 %v2199_v50, %v2742_v3  ;;  %v1403_v36 = vsel %vm1343_vm2, %v1245_v12, 0.0  ;;  %v2271_v56 = vpop.f32.mrf.mxu1 }
 0x104   :  { %v1396_v60 = vadd.f32 %v1395_v53, %v1394_v49  ;;  %v819_v61 = vpop.f32.mrf.mxu0  ;;  %v1105_v49 = vadd.f32 %v2742_v3, %v1104_v42 }
 0x105   :  { %v820_v4 = vadd.f32 %v2742_v3, %v819_v61  ;;  %v1399_v14 = vsel %vm1343_vm2, %v1243_v55, 0.0  ;;  %v1246_v23 = vmax.f32 %v828_v1, 0.0  ;;  %v1553_v55 = vadd.f32 %v1552_v48, %v1551_v33 }
 0x106   :  { %v1398_v6 = vadd.f32 %v1397_v63, %v1396_v60  ;;  %v2202_v8 = vpop.f32.mrf.mxu0  ;;  %v1556_v61 = vsel %vm1343_vm2, %v1314_v34, 0.0  ;;  %v1315_v63 = vmax.f32 %v1105_v49, 0.0 }
 0x107   :  { %v1244_v15 = vmax.f32 %v820_v4, 0.0  ;;  %v841_v38 = vadd.f32 %v2202_v8, %v2742_v3  ;;  %v1405_v50 = vsel %vm1343_vm2, %v1246_v23, 0.0  ;;  %v1555_v5 = vadd.f32 %v1554_v41, %v1553_v55 }
 0x108   :  { %v1400_v20 = vadd.f32 %v1399_v14, %v1398_v6  ;;  %v832_v21 = vpop.f32.mrf.mxu0  ;;  %v1107_v6 = vpop.f32.mrf.mxu1  ;;  %v1558_v11 = vsel %vm1343_vm2, %v1315_v63, 0.0  ;;  %v1317_v23 = vmax.f32 %v1113_v62, 0.0 }
 0x109   :  { %v1401_v26 = vsel %vm1343_vm2, %v1244_v15, 0.0  ;;  %v833_v27 = vadd.f32 %v2742_v3, %v832_v21  ;;  %v1249_v1 = vmax.f32 %v841_v38, 0.0  ;;  %v1108_v12 = vadd.f32 %v2742_v3, %v1107_v6 }
 0x10a   :  { %v1402_v29 = vadd.f32 %v1401_v26, %v1400_v20  ;;  %v2203_v30 = vpop.f32.mrf.mxu0  ;;  %v1557_v18 = vadd.f32 %v1556_v61, %v1555_v5  ;;  %v2274_v20 = vpop.f32.mrf.mxu1  ;;  %v1116_v26 = vadd.f32 %v2271_v56, %v2742_v3  ;;  %v1562_v49 = vsel %vm1343_vm2, %v1317_v23, 0.0 }
 0x10b   :  { %v1247_v45 = vmax.f32 %v833_v27, 0.0  ;;  %v844_v53 = vadd.f32 %v2203_v30, %v2742_v3  ;;  %v1316_v27 = vmax.f32 %v1108_v12, 0.0  ;;  %v1416_v28 = vsel %vm1343_vm2, %v1249_v1, 0.0 }
 0x10c   :  { %v1404_v43 = vadd.f32 %v1403_v36, %v1402_v29  ;;  %v835_v47 = vpop.f32.mrf.mxu0  ;;  %v1559_v33 = vadd.f32 %v1558_v11, %v1557_v18  ;;  %v1120_v34 = vpop.f32.mrf.mxu1 }
 0x10d   :  { %v836_v54 = vadd.f32 %v2742_v3, %v835_v47  ;;  %v1413_v8 = vsel %vm1343_vm2, %v1247_v45, 0.0  ;;  %v1250_v14 = vmax.f32 %v844_v53, 0.0  ;;  %v1560_v38 = vsel %vm1343_vm2, %v1316_v27, 0.0 }
 0x10e   :  { %v2860_v57 = vadd.f32 %v1405_v50, %v1404_v43  ;;  %v2206_v60 = vpop.f32.mrf.mxu0  ;;  %v2275_v45 = vpop.f32.mrf.mxu1  ;;  %v1318_v50 = vmax.f32 %v1116_v26, 0.0  ;;  %v1561_v53 = vadd.f32 %v1560_v38, %v1559_v33 }
 0x10f   :  { %v1248_v4 = vmax.f32 %v836_v54, 0.0  ;;  %v857_v29 = vadd.f32 %v2206_v60, %v2742_v3  ;;  %v1418_v41 = vsel %vm1343_vm2, %v1250_v14, 0.0  ;;  %v1121_v60 = vadd.f32 %v2742_v3, %v1120_v34 }
 0x110   :  { %v848_v9 = vpop.f32.mrf.mxu0  ;;  %v1123_v63 = vpop.f32.mrf.mxu1  ;;  %v1564_v11 = vsel %vm1343_vm2, %v1318_v50, 0.0  ;;  %v1563_v12 = vadd.f32 %v1562_v49, %v1561_v53  ;;  %v1129_v34 = vadd.f32 %v2274_v20, %v2742_v3  ;;  %v1132_v20 = vadd.f32 %v2275_v45, %v2742_v3 }
 0x111   :  { %v1414_v15 = vsel %vm1343_vm2, %v1248_v4, 0.0  ;;  %v849_v16 = vadd.f32 %v2742_v3, %v848_v9  ;;  %v1253_v54 = vmax.f32 %v857_v29, 0.0  ;;  %v1124_v18 = vadd.f32 %v2742_v3, %v1123_v63 }
 0x112   :  { %v1415_v21 = vadd.f32 %v1414_v15, %v1413_v8  ;;  %v2207_v22 = vpop.f32.mrf.mxu0  ;;  %v2885_v23 = vpop.f32.mrf.mxu1 }
 0x113   :  { %v1251_v30 = vmax.f32 %v849_v16, 0.0  ;;  %v860_v42 = vadd.f32 %v2207_v22, %v2742_v3  ;;  %v1424_v14 = vsel %vm1343_vm2, %v1253_v54, 0.0  ;;  %v1319_v16 = vmax.f32 %v1121_v60, 0.0 }
 0x114   :  { %v1417_v35 = vadd.f32 %v1416_v28, %v1415_v21  ;;  %v851_v36 = vpop.f32.mrf.mxu0 }
 0x115   :  { %v852_v43 = vadd.f32 %v2742_v3, %v851_v36  ;;  %v1420_v55 = vsel %vm1343_vm2, %v1251_v30, 0.0  ;;  %v1254_v1 = vmax.f32 %v860_v42, 0.0  ;;  %v1320_v42 = vmax.f32 %v1124_v18, 0.0 }
 0x116   :  { %v1419_v47 = vadd.f32 %v1418_v41, %v1417_v35  ;;  %v2210_v48 = vpop.f32.mrf.mxu0  ;;  %v1565_v35 = vadd.f32 %v1564_v11, %v1563_v12  ;;  %v1566_v41 = vsel %vm1343_vm2, %v1319_v16, 0.0 }
 0x117   :  { %v1252_v56 = vmax.f32 %v852_v43, 0.0  ;;  %v873_v8 = vadd.f32 %v2210_v48, %v2742_v3  ;;  %v1426_v26 = vsel %vm1343_vm2, %v1254_v1, 0.0  ;;  %v1136_v48 = vpop.f32.mrf.mxu1  ;;  %v1568_v1 = vsel %vm1343_vm2, %v1320_v42, 0.0 }
 0x118   :  { %v1421_v61 = vadd.f32 %v1420_v55, %v1419_v47  ;;  %v864_v62 = vpop.f32.mrf.mxu0  ;;  %v1567_v60 = vadd.f32 %v1566_v41, %v1565_v35  ;;  %v1137_v16 = vadd.f32 %v2742_v3, %v1136_v48 }
 0x119   :  { %v1422_v4 = vsel %vm1343_vm2, %v1252_v56, 0.0  ;;  %v865_v5 = vadd.f32 %v2742_v3, %v864_v62  ;;  %v1257_v29 = vmax.f32 %v873_v8, 0.0  ;;  %v1321_v56 = vmax.f32 %v1129_v34, 0.0 }
 0x11a   :  { %v1423_v6 = vadd.f32 %v1422_v4, %v1421_v61  ;;  %v2211_v9 = vpop.f32.mrf.mxu0  ;;  %v1569_v45 = vadd.f32 %v1568_v1, %v1567_v60  ;;  %v1323_v42 = vmax.f32 %v1137_v16, 0.0 }
 0x11b   :  { %v1255_v15 = vmax.f32 %v865_v5, 0.0  ;;  %v876_v27 = vadd.f32 %v2211_v9, %v2742_v3  ;;  %v1432_v61 = vsel %vm1343_vm2, %v1257_v29, 0.0 }
 0x11c   :  { %v1425_v21 = vadd.f32 %v1424_v14, %v1423_v6  ;;  %v867_v22 = vpop.f32.mrf.mxu0  ;;  %v2279_v6 = vpop.f32.mrf.mxu1  ;;  %v1574_v1 = vsel %vm1343_vm2, %v1323_v42, 0.0 }
 0x11d   :  { %v868_v28 = vadd.f32 %v2742_v3, %v867_v22  ;;  %v1428_v36 = vsel %vm1343_vm2, %v1255_v15, 0.0  ;;  %v1258_v49 = vmax.f32 %v876_v27, 0.0  ;;  %v1322_v15 = vmax.f32 %v1132_v20, 0.0 }
 0x11e   :  { %v1427_v30 = vadd.f32 %v1426_v26, %v1425_v21  ;;  %v2214_v33 = vpop.f32.mrf.mxu0  ;;  %v1570_v26 = vsel %vm1343_vm2, %v1321_v56, 0.0  ;;  %v1139_v29 = vpop.f32.mrf.mxu1 }
 0x11f   :  { %v1256_v38 = vmax.f32 %v868_v28, 0.0  ;;  %v889_v62 = vadd.f32 %v2214_v33, %v2742_v3  ;;  %v1434_v8 = vsel %vm1343_vm2, %v1258_v49, 0.0  ;;  %v1571_v41 = vadd.f32 %v1570_v26, %v1569_v45 }
 0x120   :  { %v1429_v43 = vadd.f32 %v1428_v36, %v1427_v30  ;;  %v880_v47 = vpop.f32.mrf.mxu0  ;;  %v1140_v49 = vadd.f32 %v2742_v3, %v1139_v29  ;;  %v1148_v26 = vadd.f32 %v2279_v6, %v2742_v3 }
 0x121   :  { %v1430_v50 = vsel %vm1343_vm2, %v1256_v38, 0.0  ;;  %v881_v53 = vadd.f32 %v2742_v3, %v880_v47  ;;  %v1261_v18 = vmax.f32 %v889_v62, 0.0  ;;  %v1572_v38 = vsel %vm1343_vm2, %v1322_v15, 0.0 }
 0x122   :  { %v1431_v54 = vadd.f32 %v1430_v50, %v1429_v43  ;;  %v2215_v55 = vpop.f32.mrf.mxu0  ;;  %v1145_v62 = vadd.f32 %v2885_v23, %v2742_v3 }
 0x123   :  { %v1259_v63 = vmax.f32 %v881_v53, 0.0  ;;  %v892_v9 = vadd.f32 %v2215_v55, %v2742_v3  ;;  %v1440_v43 = vsel %vm1343_vm2, %v1261_v18, 0.0 }
 0x124   :  { %v1433_v4 = vadd.f32 %v1432_v61, %v1431_v54  ;;  %v883_v5 = vpop.f32.mrf.mxu0  ;;  %v2911_v54 = vpop.f32.mrf.mxu1 }
 0x125   :  { %v884_v11 = vadd.f32 %v2742_v3, %v883_v5  ;;  %v1436_v21 = vsel %vm1343_vm2, %v1259_v63, 0.0  ;;  %v1262_v30 = vmax.f32 %v892_v9, 0.0  ;;  %v1573_v63 = vadd.f32 %v1572_v38, %v1571_v41 }
 0x126   :  { %v1435_v12 = vadd.f32 %v1434_v8, %v1433_v4  ;;  %v2218_v14 = vpop.f32.mrf.mxu0  ;;  %v1324_v9 = vmax.f32 %v1140_v49, 0.0 }
 0x127   :  { %v1260_v22 = vmax.f32 %v884_v11, 0.0  ;;  %v905_v47 = vadd.f32 %v2218_v14, %v2742_v3  ;;  %v1442_v55 = vsel %vm1343_vm2, %v1262_v30, 0.0  ;;  %v1152_v14 = vpop.f32.mrf.mxu1  ;;  %v1575_v23 = vadd.f32 %v1574_v1, %v1573_v63 }
 0x128   :  { %v1437_v27 = vadd.f32 %v1436_v21, %v1435_v12  ;;  %v896_v28 = vpop.f32.mrf.mxu0  ;;  %v1576_v30 = vsel %vm1343_vm2, %v1324_v9, 0.0 }
 0x129   :  { %v1438_v33 = vsel %vm1343_vm2, %v1260_v22, 0.0  ;;  %v897_v34 = vadd.f32 %v2742_v3, %v896_v28  ;;  %v1265_v4 = vmax.f32 %v905_v47, 0.0  ;;  %v1325_v22 = vmax.f32 %v1145_v62, 0.0 }
 0x12a   :  { %v1439_v35 = vadd.f32 %v1438_v33, %v1437_v27  ;;  %v2219_v36 = vpop.f32.mrf.mxu0  ;;  %v1326_v47 = vmax.f32 %v1148_v26, 0.0  ;;  %v1577_v6 = vadd.f32 %v1576_v30, %v1575_v23  ;;  %v1161_v26 = vadd.f32 %v2911_v54, %v2742_v3 }
 0x12b   :  { %v1263_v48 = vmax.f32 %v897_v34, 0.0  ;;  %v908_v56 = vadd.f32 %v2219_v36, %v2742_v3  ;;  %v1448_v27 = vsel %vm1343_vm2, %v1265_v4, 0.0 }
 0x12c   :  { %v1441_v50 = vadd.f32 %v1440_v43, %v1439_v35  ;;  %v899_v53 = vpop.f32.mrf.mxu0  ;;  %v2283_v35 = vpop.f32.mrf.mxu1 }
 0x12d   :  { %v900_v60 = vadd.f32 %v2742_v3, %v899_v53  ;;  %v1444_v5 = vsel %vm1343_vm2, %v1263_v48, 0.0  ;;  %v1266_v15 = vmax.f32 %v908_v56, 0.0  ;;  %v1153_v48 = vadd.f32 %v2742_v3, %v1152_v14 }
 0x12e   :  { %v1443_v20 = vadd.f32 %v1442_v55, %v1441_v50  ;;  %v2222_v61 = vpop.f32.mrf.mxu0  ;;  %v1578_v55 = vsel %vm1343_vm2, %v1325_v22, 0.0 }
 0x12f   :  { %v1264_v8 = vmax.f32 %v900_v60, 0.0  ;;  %v921_v28 = vadd.f32 %v2222_v61, %v2742_v3  ;;  %v1450_v36 = vsel %vm1343_vm2, %v1266_v15, 0.0  ;;  %v1327_v9 = vmax.f32 %v1153_v48, 0.0 }
 0x130   :  { %v1445_v11 = vadd.f32 %v1444_v5, %v1443_v20  ;;  %v912_v12 = vpop.f32.mrf.mxu0  ;;  %v1155_v20 = vpop.f32.mrf.mxu1  ;;  %v1580_v5 = vsel %vm1343_vm2, %v1326_v47, 0.0 }
 0x131   :  { %v1446_v45 = vsel %vm1343_vm2, %v1264_v8, 0.0  ;;  %v913_v16 = vadd.f32 %v2742_v3, %v912_v12  ;;  %v1269_v49 = vmax.f32 %v921_v28, 0.0  ;;  %v1579_v8 = vadd.f32 %v1578_v55, %v1577_v6 }
 0x132   :  { %v1447_v18 = vadd.f32 %v1446_v45, %v1445_v11  ;;  %v2223_v21 = vpop.f32.mrf.mxu0  ;;  %v1156_v15 = vadd.f32 %v2742_v3, %v1155_v20  ;;  %v1582_v30 = vsel %vm1343_vm2, %v1327_v9, 0.0 }
 0x133   :  { %v1267_v29 = vmax.f32 %v913_v16, 0.0  ;;  %v924_v38 = vadd.f32 %v2223_v21, %v2742_v3  ;;  %v1456_v11 = vsel %vm1343_vm2, %v1269_v49, 0.0  ;;  %v1329_v49 = vmax.f32 %v1161_v26, 0.0 }
 0x134   :  { %v1449_v33 = vadd.f32 %v1448_v27, %v1447_v18  ;;  %v915_v34 = vpop.f32.mrf.mxu0  ;;  %v2938_v18 = vpop.f32.mrf.mxu1  ;;  %v2451_v26 = vmov 0.0  }
 0x135   :  { %v916_v41 = vadd.f32 %v2742_v3, %v915_v34  ;;  %v1452_v50 = vsel %vm1343_vm2, %v1267_v29, 0.0  ;;  %v1270_v61 = vmax.f32 %v924_v38, 0.0  ;;  %v1581_v29 = vadd.f32 %v1580_v5, %v1579_v8  ;;  %v2412_v8 = vld [vmem:[%s3183_s2 + $0x38] sm:$0xff]   ;;  %2296 = vmatprep.subr.bf16.mxu1 %v2451_v26  ;;  %2312 = vmatprep.mubr.msk.bf16.mxu1 %vm2452_vm4, %v2451_v26 }
 0x136   :  { %v1451_v42 = vadd.f32 %v1450_v36, %v1449_v33  ;;  %v2226_v43 = vpop.f32.mrf.mxu0  ;;  %v1328_v38 = vmax.f32 %v1156_v15, 0.0  ;;  %v1168_v47 = vpop.f32.mrf.mxu1  ;;  %2297 = vmatpush3.bf16.msra.mxu1 %v2412_v8 }
 0x137   :  { %v1268_v53 = vmax.f32 %v916_v41, 0.0  ;;  %v937_v12 = vadd.f32 %v2226_v43, %v2742_v3  ;;  %v1458_v21 = vsel %vm1343_vm2, %v1270_v61, 0.0  ;;  %v1407_v41 = vrot.slane %v2860_v57, 4  ;;  %2298 = vmatprep.subr.bf16.mxu1 %v2451_v26 }
 0x138   :  { %v1453_v56 = vadd.f32 %v1452_v50, %v1451_v42  ;;  %v928_v60 = vpop.f32.mrf.mxu0  ;;  %v1583_v55 = vadd.f32 %v1582_v30, %v1581_v29  ;;  %v2287_v5 = vpop.f32.mrf.mxu1  ;;  %v2413_v30 = vld [vmem:[%s3183_s2 + $0x30] sm:$0xff]  }
 0x139   :  { %v1454_v62 = vsel %vm1343_vm2, %v1268_v53, 0.0  ;;  %v929_v63 = vadd.f32 %v2742_v3, %v928_v60  ;;  %v1273_v33 = vmax.f32 %v937_v12, 0.0  ;;  %v1586_v12 = vsel %vm1343_vm2, %v1329_v49, 0.0 }
 0x13a   :  { %v1455_v1 = vadd.f32 %v1454_v62, %v1453_v56  ;;  %v2227_v4 = vpop.f32.mrf.mxu0  ;;  %v1164_v56 = vadd.f32 %v2283_v35, %v2742_v3  ;;  %v1584_v62 = vsel %vm1343_vm2, %v1328_v38, 0.0  ;;  %v1171_v29 = vpop.f32.mrf.mxu1  ;;  %2299 = vmatpush3.bf16.msra.mxu1 %v2413_v30 }
 0x13b   :  { %v1271_v14 = vmax.f32 %v929_v63, 0.0  ;;  %v940_v22 = vadd.f32 %v2227_v4, %v2742_v3  ;;  %v1464_v60 = vsel %vm1343_vm2, %v1273_v33, 0.0  ;;  %v1408_v63 = vadd.f32 %v1407_v41, %v2860_v57  ;;  %2300 = vmatprep.subr.bf16.mxu1 %v2451_v26 }
 0x13c   :  { %v1457_v45 = vadd.f32 %v1456_v11, %v1455_v1  ;;  %v931_v16 = vpop.f32.mrf.mxu0  ;;  %v1172_v49 = vadd.f32 %v2742_v3, %v1171_v29 }
 0x13d   :  { %v932_v23 = vadd.f32 %v2742_v3, %v931_v16  ;;  %v1460_v34 = vsel %vm1343_vm2, %v1271_v14, 0.0  ;;  %v1274_v6 = vmax.f32 %v940_v22, 0.0  ;;  %v1585_v16 = vadd.f32 %v1584_v62, %v1583_v55 }
 0x13e   :  { %v1459_v27 = vadd.f32 %v1458_v21, %v1457_v45  ;;  %v2230_v28 = vpop.f32.mrf.mxu0  ;;  %v1330_v45 = vmax.f32 %v1164_v56, 0.0  ;;  %v1409_v38 = vrot.slane %v1408_v63, 2  ;;  %v1177_v55 = vadd.f32 %v2938_v18, %v2742_v3  ;;  %v2977_v56 = vpop.f32.mrf.mxu1 }
 0x13f   :  { %v1272_v36 = vmax.f32 %v932_v23, 0.0  ;;  %v953_v20 = vadd.f32 %v2230_v28, %v2742_v3  ;;  %v1466_v9 = vsel %vm1343_vm2, %v1274_v6, 0.0  ;;  %v1169_v23 = vadd.f32 %v2742_v3, %v1168_v47 }
 0x140   :  { %v1461_v42 = vadd.f32 %v1460_v34, %v1459_v27  ;;  %v944_v43 = vpop.f32.mrf.mxu0  ;;  %v1587_v47 = vadd.f32 %v1586_v12, %v1585_v16  ;;  %v1333_v16 = vmax.f32 %v1177_v55, 0.0 }
 0x141   :  { %v1462_v48 = vsel %vm1343_vm2, %v1272_v36, 0.0  ;;  %v945_v54 = vadd.f32 %v2742_v3, %v944_v43  ;;  %v1277_v57 = vmax.f32 %v953_v20, 0.0  ;;  %v1588_v43 = vsel %vm1343_vm2, %v1330_v45, 0.0 }
 0x142   :  { %v1463_v50 = vadd.f32 %v1462_v48, %v1461_v42  ;;  %v2231_v53 = vpop.f32.mrf.mxu0  ;;  %v1589_v18 = vadd.f32 %v1588_v43, %v1587_v47 }
 0x143   :  { %v1275_v61 = vmax.f32 %v945_v54, 0.0  ;;  %v956_v35 = vadd.f32 %v2231_v53, %v2742_v3  ;;  %v1472_v6 = vsel %vm1343_vm2, %v1277_v57, 0.0  ;;  %v1331_v54 = vmax.f32 %v1169_v23, 0.0 }
 0x144   :  { %v1465_v1 = vadd.f32 %v1464_v60, %v1463_v50  ;;  %v947_v4 = vpop.f32.mrf.mxu0  ;;  %v2414_v60 = vld [vmem:[%s3183_s2 + $0x28] sm:$0xff]   ;;  %v1180_v57 = vadd.f32 %v2287_v5, %v2742_v3 }
 0x145   :  { %v948_v11 = vadd.f32 %v2742_v3, %v947_v4  ;;  %v1468_v21 = vsel %vm1343_vm2, %v1275_v61, 0.0  ;;  %v1278_v33 = vmax.f32 %v956_v35, 0.0  ;;  %v1410_v4 = vadd.f32 %v1409_v38, %v1408_v63  ;;  %2301 = vmatpush3.bf16.msra.mxu1 %v2414_v60 }
 0x146   :  { %v1467_v14 = vadd.f32 %v1466_v9, %v1465_v1  ;;  %v2234_v15 = vpop.f32.mrf.mxu0  ;;  %v1590_v12 = vsel %vm1343_vm2, %v1331_v54, 0.0  ;;  %2302 = vmatprep.subr.bf16.mxu1 %v2451_v26 }
 0x147   :  { %v1276_v22 = vmax.f32 %v948_v11, 0.0  ;;  %v969_v48 = vadd.f32 %v2234_v15, %v2742_v3  ;;  %v1474_v20 = vsel %vm1343_vm2, %v1278_v33, 0.0  ;;  %v1411_v5 = vrot.slane %v1410_v4, 1 }
 0x148   :  { %v1469_v27 = vadd.f32 %v1468_v21, %v1467_v14  ;;  %v960_v28 = vpop.f32.mrf.mxu0  ;;  %v1332_v14 = vmax.f32 %v1172_v49, 0.0  ;;  %v1184_v21 = vpop.f32.mrf.mxu1  ;;  %v2416_v49 = vld [vmem:[%s3183_s2 + $0x18] sm:$0xff]  }
 0x149   :  { %v1470_v34 = vsel %vm1343_vm2, %v1276_v22, 0.0  ;;  %v961_v36 = vadd.f32 %v2742_v3, %v960_v28  ;;  %v1281_v35 = vmax.f32 %v969_v48, 0.0  ;;  %v2415_v22 = vld [vmem:[%s3183_s2 + $0x20] sm:$0xff]   ;;  %v1334_v48 = vmax.f32 %v1180_v57, 0.0 }
 0x14a   :  { %v1471_v41 = vadd.f32 %v1470_v34, %v1469_v27  ;;  %v2235_v42 = vpop.f32.mrf.mxu0  ;;  %v1591_v34 = vadd.f32 %v1590_v12, %v1589_v18  ;;  %v2998_v54 = vpop.f32.mrf.mxu1  ;;  %2303 = vmatpush3.bf16.msra.mxu1 %v2415_v22  ;;  %v1185_v60 = vadd.f32 %v2742_v3, %v1184_v21  ;;  %v3013_v12 = vld [vmem:[%s3184_s3] ss:$0 sm:$0xff] }
 0x14b   :  { %v1279_v61 = vmax.f32 %v961_v36, 0.0  ;;  %v972_v62 = vadd.f32 %v2235_v42, %v2742_v3  ;;  %v1485_v36 = vsel %vm1343_vm2, %v1281_v35, 0.0  ;;  %v1592_v42 = vsel %vm1343_vm2, %v1332_v14, 0.0  ;;  %2304 = vmatprep.subr.bf16.mxu1 %v2451_v26 }
 0x14c   :  { %v1473_v50 = vadd.f32 %v1472_v6, %v1471_v41  ;;  %v963_v53 = vpop.f32.mrf.mxu0 }
 0x14d   :  { %v964_v1 = vadd.f32 %v2742_v3, %v963_v53  ;;  %v1482_v63 = vsel %vm1343_vm2, %v1279_v61, 0.0  ;;  %v1282_v23 = vmax.f32 %v972_v62, 0.0 }
 0x14e   :  { %v1475_v8 = vadd.f32 %v1474_v20, %v1473_v50  ;;  %v2238_v9 = vpop.f32.mrf.mxu0  ;;  %2305 = vmatpush3.bf16.msra.mxu1 %v2416_v49 }
 0x14f   :  { %v1280_v11 = vmax.f32 %v964_v1, 0.0  ;;  %v985_v38 = vadd.f32 %v2238_v9, %v2742_v3  ;;  %v1487_v50 = vsel %vm1343_vm2, %v1282_v23, 0.0  ;;  %v1593_v1 = vadd.f32 %v1592_v42, %v1591_v34  ;;  %2306 = vmatprep.subr.bf16.mxu1 %v2451_v26 }
 0x150   :  { %v1476_v15 = vrot.slane %v1475_v8, 4  ;;  %v976_v45 = vpop.f32.mrf.mxu0  ;;  %v1335_v23 = vmax.f32 %v1185_v60, 0.0  ;;  %v1193_v42 = vadd.f32 %v3013_v12, %v2977_v56 }
 0x151   :  { %v1483_v27 = vsel %vm1343_vm2, %v1280_v11, 0.0  ;;  %v977_v28 = vadd.f32 %v2742_v3, %v976_v45  ;;  %v1285_v9 = vmax.f32 %v985_v38, 0.0  ;;  %v1594_v11 = vsel %vm1343_vm2, %v1333_v16, 0.0  ;;  %v2417_v16 = vld [vmem:[%s3183_s2 + $0x10] sm:$0xff]  }
 0x152   :  { %v1477_v29 = vadd.f32 %v1476_v15, %v1475_v8  ;;  %v1484_v30 = vadd.f32 %v1483_v27, %v1482_v63  ;;  %v2239_v33 = vpop.f32.mrf.mxu0  ;;  %v1412_v8 = vadd.f32 %v1411_v5, %v1410_v4  ;;  %v1596_v45 = vsel %vm1343_vm2, %v1334_v48, 0.0  ;;  %v1187_v4 = vpop.f32.mrf.mxu1  ;;  %2307 = vmatpush3.bf16.msra.mxu1 %v2417_v16 }
 0x153   :  { %v1283_v41 = vmax.f32 %v977_v28, 0.0  ;;  %v988_v53 = vadd.f32 %v2239_v33, %v2742_v3  ;;  %v1595_v28 = vadd.f32 %v1594_v11, %v1593_v1  ;;  %v1493_v33 = vsel %vm1343_vm2, %v1285_v9, 0.0  ;;  %2308 = vmatprep.subr.bf16.mxu1 %v2451_v26  ;;  %v2419_v11 = vld [vmem:[%s3183_s2] sm:$0xff]  }
 0x154   :  { %v1478_v43 = vrot.slane %v1477_v29, 2  ;;  %v1486_v47 = vadd.f32 %v1485_v36, %v1484_v30  ;;  %v979_v6 = vpop.f32.mrf.mxu0  ;;  %v1620_v30 = vpack.c.bf16 %v1412_v8, %v1412_v8  ;;  %v1188_v36 = vadd.f32 %v3013_v12, %v1187_v4 }
 0x155   :  { %v980_v55 = vadd.f32 %v2742_v3, %v979_v6  ;;  %v1489_v18 = vsel %vm1343_vm2, %v1283_v41, 0.0  ;;  %v3017_v3 = vadd.f32 %v3013_v12, %v2763_v46  ;;  %v1286_v21 = vmax.f32 %v988_v53, 0.0  ;;  %v2418_v6 = vld [vmem:[%s3183_s2 + $0x8] sm:$0xff]  }
 0x156   :  { %v1479_v20 = vadd.f32 %v1478_v43, %v1477_v29  ;;  %v1488_v61 = vadd.f32 %v1487_v50, %v1486_v47  ;;  %v2242_v62 = vpop.f32.mrf.mxu0  ;;  %v3031_v43 = vpop.f32.mrf.mxu1  ;;  %v1598_v53 = vsel %vm1343_vm2, %v1335_v23, 0.0  ;;  %v1626_v60 = vunpack.c.l.b16 %v1620_v30  ;;  %2309 = vmatpush3.bf16.msra.mxu1 %v2418_v6 }
 0x157   :  { %v1284_v35 = vmax.f32 %v980_v55, 0.0  ;;  %v1001_v34 = vadd.f32 %v3013_v12, %v2242_v62  ;;  %v1495_v48 = vsel %vm1343_vm2, %v1286_v21, 0.0  ;;  %v1597_v55 = vadd.f32 %v1596_v45, %v1595_v28  ;;  %2310 = vmatprep.subr.bf16.mxu1 %v2451_v26 }
 0x158   :  { %v1490_v14 = vadd.f32 %v1489_v18, %v1488_v61  ;;  %v992_v15 = vpop.f32.mrf.mxu0  ;;  %v1480_v57 = vrot.slane %v1479_v20, 1  ;;  %v1336_v8 = vmax.f32 %v1188_v36, 0.0  ;;  %v1200_v18 = vpop.f32.mrf.mxu1  ;;  %v1017_v4 = vadd.f32 %v3013_v12, %v2759_v40 }
 0x159   :  { %v1491_v22 = vsel %vm1343_vm2, %v1284_v35, 0.0  ;;  %v993_v63 = vadd.f32 %v3013_v12, %v992_v15  ;;  %v1289_v61 = vmax.f32 %v1001_v34, 0.0  ;;  %v1599_v21 = vadd.f32 %v1598_v53, %v1597_v55 }
 0x15a   :  { %v1492_v46 = vadd.f32 %v1491_v22, %v1490_v14  ;;  %v2243_v27 = vpop.f32.mrf.mxu0  ;;  %v1481_v29 = vadd.f32 %v1480_v57, %v1479_v20  ;;  %v1012_v14 = vadd.f32 %v3013_v12, %v2771_v58  ;;  %v1291_v57 = vmax.f32 %v3017_v3, 0.0  ;;  %2311 = vmatpush3.bf16.msra.mxu1 %v2419_v11 }
 0x15b   :  { %v1287_v5 = vmax.f32 %v993_v63, 0.0  ;;  %v1004_v49 = vadd.f32 %v3013_v12, %v2243_v27  ;;  %v1501_v22 = vsel %vm1343_vm2, %v1289_v61, 0.0  ;;  %v1337_v63 = vmax.f32 %v1193_v42, 0.0  ;;  %v2295_v27 = vpop.f32.mrf.mxu1  ;;  %2316 = vmatprep.subr.bf16.mxu1 %v2451_v26 }
 0x15c   :  { %v1494_v38 = vadd.f32 %v1493_v33, %v1492_v46  ;;  %v995_v41 = vpop.f32.mrf.mxu0  ;;  %v1621_v47 = vpack.c.bf16 %v1481_v29, %v1481_v29  ;;  %v1196_v23 = vadd.f32 %v3013_v12, %v2998_v54  ;;  %v1600_v58 = vsel %vm1343_vm2, %v1336_v8, 0.0 }
 0x15d   :  { %v996_v50 = vadd.f32 %v3013_v12, %v995_v41  ;;  %v1497_v62 = vsel %vm1343_vm2, %v1287_v5, 0.0  ;;  %v1290_v15 = vmax.f32 %v1004_v49, 0.0  ;;  %v1020_v28 = vadd.f32 %v3013_v12, %v2768_v52  ;;  %v1203_v52 = vpop.f32.mrf.mxu1 }
 0x15e   :  { %v1496_v56 = vadd.f32 %v1495_v48, %v1494_v38  ;;  %v1627_v20 = vunpack.c.l.b16 %v1621_v47  ;;  %v1292_v29 = vmax.f32 %v1012_v14, 0.0  ;;  %v1293_v3 = vmax.f32 %v1017_v4, 0.0 }
 0x15f   :  { %v1288_v1 = vmax.f32 %v996_v50, 0.0  ;;  %v1503_v40 = vsel %vm1343_vm2, %v1290_v15, 0.0  ;;  %v1025_v30 = vadd.f32 %v3013_v12, %v2779_v7  ;;  %v1601_v34 = vadd.f32 %v1600_v58, %v1599_v21 }
 0x160   :  { %v1498_v9 = vadd.f32 %v1497_v62, %v1496_v56  ;;  %v3043_v35 = vsel %vm1628_vm3, %v1627_v20, %v1626_v60  ;;  %v1505_v54 = vsel %vm1343_vm2, %v1291_v57, 0.0  ;;  %v1602_v5 = vsel %vm1343_vm2, %v1337_v63, 0.0 }
 0x161   :  { %v1499_v45 = vsel %vm1343_vm2, %v1288_v1, 0.0  ;;  %v1338_v36 = vmax.f32 %v1196_v23, 0.0  ;;  %v1201_v38 = vadd.f32 %v3013_v12, %v1200_v18  ;;  %v1294_v42 = vmax.f32 %v1020_v28, 0.0 }
 0x162   :  { %v1500_v16 = vadd.f32 %v1499_v45, %v1498_v9  ;;  %v1507_v47 = vsel %vm1343_vm2, %v1292_v29, 0.0  ;;  %v1028_v6 = vadd.f32 %v3013_v12, %v2787_v19  ;;  %v1033_v7 = vadd.f32 %v3013_v12, %v2775_v0 }
 0x163   :  { %v1295_v48 = vmax.f32 %v1025_v30, 0.0  ;;  %v1603_v50 = vadd.f32 %v1602_v5, %v1601_v34  ;;  %v1509_v53 = vsel %vm1343_vm2, %v1293_v3, 0.0  ;;  %v1604_v56 = vsel %vm1343_vm2, %v1338_v36, 0.0 }
 0x164   :  { %v1502_v46 = vadd.f32 %v1501_v22, %v1500_v16  ;;  %v1339_v55 = vmax.f32 %v1201_v38, 0.0  ;;  %v1204_v60 = vadd.f32 %v3013_v12, %v1203_v52  ;;  %v1511_v61 = vsel %vm1343_vm2, %v1294_v42, 0.0 }
 0x165   :  { %v1036_v62 = vadd.f32 %v3013_v12, %v2784_v13  ;;  %v1296_v19 = vmax.f32 %v1028_v6, 0.0  ;;  %v1297_v1 = vmax.f32 %v1033_v7, 0.0  ;;  %v1513_v0 = vsel %vm1343_vm2, %v1295_v48, 0.0 }
 0x166   :  { %v1504_v33 = vadd.f32 %v1503_v40, %v1502_v46  ;;  %v1605_v9 = vadd.f32 %v1604_v56, %v1603_v50  ;;  %v1041_v18 = vadd.f32 %v3013_v12, %v2795_v31  ;;  %v1209_v11 = vadd.f32 %v3013_v12, %v3031_v43 }
 0x167   :  { %v1606_v14 = vsel %vm1343_vm2, %v1339_v55, 0.0  ;;  %v1340_v15 = vmax.f32 %v1204_v60, 0.0  ;;  %v1298_v4 = vmax.f32 %v1036_v62, 0.0  ;;  %v1515_v57 = vsel %vm1343_vm2, %v1296_v19, 0.0 }
 0x168   :  { %v1506_v41 = vadd.f32 %v1505_v54, %v1504_v33  ;;  %v1044_v13 = vadd.f32 %v3013_v12, %v2803_v44  ;;  %v1517_v16 = vsel %vm1343_vm2, %v1297_v1, 0.0  ;;  %v1049_v21 = vadd.f32 %v3013_v12, %v2791_v25 }
 0x169   :  { %v1607_v31 = vadd.f32 %v1606_v14, %v1605_v9  ;;  %v1299_v63 = vmax.f32 %v1041_v18, 0.0  ;;  %v1341_v23 = vmax.f32 %v1209_v11, 0.0  ;;  %v1212_v43 = vadd.f32 %v3013_v12, %v2295_v27 }
 0x16a   :  { %v1508_v49 = vadd.f32 %v1507_v47, %v1506_v41  ;;  %v1608_v58 = vsel %vm1343_vm2, %v1340_v15, 0.0  ;;  %v1519_v28 = vsel %vm1343_vm2, %v1298_v4, 0.0  ;;  %v1052_v29 = vadd.f32 %v3013_v12, %v2800_v37 }
 0x16b   :  { %v1300_v44 = vmax.f32 %v1044_v13, 0.0  ;;  %v1301_v40 = vmax.f32 %v1049_v21, 0.0  ;;  %v1609_v30 = vadd.f32 %v1608_v58, %v1607_v31  ;;  %v1521_v25 = vsel %vm1343_vm2, %v1299_v63, 0.0 }
 0x16c   :  { %v1510_v20 = vadd.f32 %v1509_v53, %v1508_v49  ;;  %v1057_v33 = vadd.f32 %v3013_v12, %v2811_v59  ;;  %v1610_v34 = vsel %vm1343_vm2, %v1341_v23, 0.0  ;;  %v1342_v27 = vmax.f32 %v1212_v43, 0.0 }
 0x16d   :  { %v1302_v5 = vmax.f32 %v1052_v29, 0.0  ;;  %v1523_v36 = vsel %vm1343_vm2, %v1300_v44, 0.0  ;;  %v1060_v38 = vadd.f32 %v3013_v12, %v2819_v10  ;;  %v1611_v41 = vadd.f32 %v1610_v34, %v1609_v30 }
 0x16e   :  { %v1512_v8 = vadd.f32 %v1511_v61, %v1510_v20  ;;  %v1525_v52 = vsel %vm1343_vm2, %v1301_v40, 0.0  ;;  %v1065_v42 = vadd.f32 %v3013_v12, %v2807_v51  ;;  %v1303_v47 = vmax.f32 %v1057_v33, 0.0 }
 0x16f   :  { %v1612_v59 = vsel %vm1343_vm2, %v1342_v27, 0.0  ;;  %v1527_v7 = vsel %vm1343_vm2, %v1302_v5, 0.0  ;;  %v1068_v48 = vadd.f32 %v3013_v12, %v2816_v2  ;;  %v1304_v49 = vmax.f32 %v1060_v38, 0.0  ;;  %v2420_v27 = vld [vmem:[%s3183_s2 + $0x58] sm:$0xff]   ;;  %v2423_v38 = vld [vmem:[%s3183_s2 + $0x40] sm:$0xff]  }
 0x170   :  { %v1514_v45 = vadd.f32 %v1513_v0, %v1512_v8  ;;  %v1613_v50 = vadd.f32 %v1612_v59, %v1611_v41  ;;  %v1305_v10 = vmax.f32 %v1065_v42, 0.0  ;;  %v1529_v56 = vsel %vm1343_vm2, %v1303_v47, 0.0 }
 0x171   :  { %v1073_v55 = vadd.f32 %v3013_v12, %v2827_v24  ;;  %v1306_v51 = vmax.f32 %v1068_v48, 0.0  ;;  %v1531_v20 = vsel %vm1343_vm2, %v1304_v49, 0.0  ;;  %v1076_v61 = vadd.f32 %v3013_v12, %v2835_v39  ;;  %v2425_v49 = vld [vmem:[%s3183_s2 + $0x70] sm:$0xff]  }
 0x172   :  { %v1516_v22 = vadd.f32 %v1515_v57, %v1514_v45  ;;  %v1614_v62 = vrot.slane %v1613_v50, 4  ;;  %v1533_v2 = vsel %vm1343_vm2, %v1305_v10, 0.0  ;;  %v1081_v1 = vadd.f32 %v3013_v12, %v2823_v17  ;;  %v2070_v10 = vld [vmem:[%s3184_s3 + $0x2] ss:$0 sm:$0xff] }
 0x173   :  { %v1307_v0 = vmax.f32 %v1073_v55, 0.0  ;;  %v1535_v9 = vsel %vm1343_vm2, %v1306_v51, 0.0  ;;  %v1084_v24 = vadd.f32 %v3013_v12, %v2832_v32  ;;  %v1308_v18 = vmax.f32 %v1076_v61, 0.0 }
 0x174   :  { %v1518_v46 = vadd.f32 %v1517_v16, %v1516_v22  ;;  %v1615_v11 = vadd.f32 %v1614_v62, %v1613_v50  ;;  %v1309_v15 = vmax.f32 %v1081_v1, 0.0  ;;  %v1630_v34 = vpack.c.b16 %v3043_v35, %v3043_v35  ;;  %v2422_v35 = vld [vmem:[%s3183_s2 + $0x48] sm:$0xff]  }
 0x175   :  { %v1537_v39 = vsel %vm1343_vm2, %v1307_v0, 0.0  ;;  %v1310_v4 = vmax.f32 %v1084_v24, 0.0  ;;  %v1539_v57 = vsel %vm1343_vm2, %v1308_v18, 0.0  ;;  %v2426_v50 = vld [vmem:[%s3183_s2 + $0x68] sm:$0xff]  }
 0x176   :  { %v1520_v3 = vadd.f32 %v1519_v28, %v1518_v46  ;;  %v1616_v16 = vrot.slane %v1615_v11, 2  ;;  %v1541_v17 = vsel %vm1343_vm2, %v1309_v15, 0.0 }
 0x177   :  { %v1543_v22 = vsel %vm1343_vm2, %v1310_v4, 0.0 }
 0x178   :  { %v1522_v54 = vadd.f32 %v1521_v25, %v1520_v3  ;;  %v1617_v63 = vadd.f32 %v1616_v16, %v1615_v11 }
 0x17a   :  { %v1524_v37 = vadd.f32 %v1523_v36, %v1522_v54  ;;  %v1618_v23 = vrot.slane %v1617_v63, 1  ;;  %v2421_v36 = vld [vmem:[%s3183_s2 + $0x50] sm:$0xff]  }
 0x17c   :  { %v1526_v6 = vadd.f32 %v1525_v52, %v1524_v37  ;;  %v1619_v46 = vadd.f32 %v1618_v23, %v1617_v63  ;;  %v2061_v37 = vld [vmem:[%s3184_s3 + $0x1] ss:$0 sm:$0xff] }
 0x17e   :  { %v1528_v53 = vadd.f32 %v1527_v7, %v1526_v6  ;;  %v1623_v44 = vpack.c.bf16 %v1619_v46, %v1619_v46  ;;  %v2424_v6 = vld [vmem:[%s3183_s2 + $0x78] sm:$0xff]  }
 0x180   :  { %v1530_v60 = vadd.f32 %v1529_v56, %v1528_v53  ;;  %v1634_v30 = vunpack.c.l.b16 %v1623_v44  ;;  %v2427_v53 = vld [vmem:[%s3183_s2 + $0x60] sm:$0xff]   ;;  %s2454_s2 = smov [#allocation2]  }
 0x181   :  { %s1924_s23 = sshll.u32 %s2454_s2, 4  ;;  %s1925_s23 = int_to_ptr.vmem [resolvable:$true] %s1924_s23 }
 0x182   :  { %v1532_v19 = vadd.f32 %v1531_v20, %v1530_v60  ;;  %s2429_s24 = scalar_lea.vmem %s1925_s23, 32  ;;  %p2434_p1 = scmp.lt.s32.totalorder %s1925_s23, %s1925_s23 }
 0x183   :  { %p2430_p0 = scmp.ne.s32.totalorder %s1925_s23, %s2429_s24  ;;  %p2435_p2 = scmp.lt.s32.totalorder %s2429_s24, %s2429_s24 }
 0x184   :  { %v1534_v8 = vadd.f32 %v1533_v2, %v1532_v19  ;;  %v2076_v19 = vld [vmem:[%s3184_s3 + $0x3] ss:$0 sm:$0xff] }
 0x185   :  { %p2436_p3 = por %p2435_p2, %p2434_p1 }
 0x186   :  { %v1536_v14 = vadd.f32 %v1535_v9, %v1534_v8 }
 0x187   :  { %p2437_p4 = pnand %p2436_p3, %p2430_p0 }
 0x188   :  { %v1538_v45 = vadd.f32 %v1537_v39, %v1536_v14 }
 0x18a   :  { %v1540_v13 = vadd.f32 %v1539_v57, %v1538_v45 }
 0x18c   :  { %v1542_v21 = vadd.f32 %v1541_v17, %v1540_v13 }
 0x18e   :  { %v1544_v31 = vadd.f32 %v1543_v22, %v1542_v21 }
 0x190   :  { %v1545_v32 = vrot.slane %v1544_v31, 4 }
 0x192   :  { %v1546_v12 = vadd.f32 %v1545_v32, %v1544_v31 }
 0x194   :  { %v1547_v43 = vrot.slane %v1546_v12, 2 }
 0x196   :  { %v1548_v58 = vadd.f32 %v1547_v43, %v1546_v12 }
 0x198   :  { %v1549_v28 = vrot.slane %v1548_v58, 1 }
 0x19a   :  { %v1550_v29 = vadd.f32 %v1549_v28, %v1548_v58 }
 0x19c   :  { %v1622_v40 = vpack.c.bf16 %v1550_v29, %v1550_v29 }
 0x19e   :  { %v1633_v3 = vunpack.c.l.b16 %v1622_v40 }
 0x1a0   :  { %v1635_v25 = vsel %vm1628_vm3, %v1634_v30, %v1633_v3 }
 0x1a1   :  { %v1636_v33 = vpack.c.b16 %v1635_v25, %v1635_v25 }
 0x1a3   :  { %1637 = vrot.lane.b32.xlu0 %v1636_v33, %s2453_s28 }
 0x215   :  { %v1638_v54 = vpop.permute.xlu0 %1637 }
 0x216   :  { %v1641_v5 = vsel %vm1343_vm2, %v1630_v34, %v1638_v54 }
 0x217   :  { %2313 = vmatmul.mubr.bf16.vlgmr.msra.gmra.mxu1 %v1641_v5 }
 0x218   :  { %2317 = vmatpush3.bf16.msra.mxu1 %v2420_v27  ;;  %2324 = vmatprep.mubr.msk.bf16.mxu1 %vm2452_vm4, %v2451_v26 }
 0x219   :  { %2318 = vmatprep.subr.bf16.mxu1 %v2451_v26 }
 0x21c   :  { %2319 = vmatpush3.bf16.msra.mxu1 %v2421_v36 }
 0x21d   :  { %2320 = vmatprep.subr.bf16.mxu1 %v2451_v26 }
 0x220   :  { %2321 = vmatpush3.bf16.msra.mxu1 %v2422_v35 }
 0x221   :  { %2322 = vmatprep.subr.bf16.mxu1 %v2451_v26 }
 0x224   :  { %2323 = vmatpush3.bf16.msra.mxu1 %v2423_v38 }
 0x225   :  { %2328 = vmatprep.subr.bf16.mxu1 %v2451_v26 }
 0x2d7   :  { %v1746_v41 = vpop.f32.mrf.mxu1 }
 0x2d8   :  { %v1747_v52 = vadd.f32 %v2061_v37, %v1746_v41 }
 0x2d9   :  { %v2314_v42 = vpop.f32.mrf.mxu1 }
 0x2da   :  { %v1752_v47 = vmax.f32 %v1747_v52, 0.0 }
 0x2db   :  { %v1749_v59 = vpop.f32.mrf.mxu1 }
 0x2dc   :  { %v1753_v7 = vpack.c.bf16 %v1752_v47, %v1752_v47 }
 0x2dd   :  { %v2315_v48 = vpop.f32.mrf.mxu1 }
 0x2de   :  { %2325 = vmatmul.mubr.msk.bf16.vlgmr.msra.gmra.mxu1 %vm1343_vm2, %v1753_v7 }
 0x2df   :  { %2329 = vmatpush3.bf16.msra.mxu1 %v2424_v6  ;;  %2336 = vmatprep.mubr.msk.bf16.mxu1 %vm2452_vm4, %v2451_v26 }
 0x2e0   :  { %2330 = vmatprep.subr.bf16.mxu1 %v2451_v26 }
 0x2e3   :  { %2331 = vmatpush3.bf16.msra.mxu1 %v2425_v49 }
 0x2e4   :  { %2332 = vmatprep.subr.bf16.mxu1 %v2451_v26 }
 0x2e7   :  { %2333 = vmatpush3.bf16.msra.mxu1 %v2426_v50 }
 0x2e8   :  { %2334 = vmatprep.subr.bf16.mxu1 %v2451_v26 }
 0x2eb   :  { %2335 = vmatpush3.bf16.msra.mxu1 %v2427_v53 }
 0x39e   :  { %v1828_v56 = vpop.f32.mrf.mxu1 }
 0x39f   :  { %v1829_v55 = vadd.f32 %v2070_v10, %v1828_v56 }
 0x3a0   :  { %v2326_v60 = vpop.f32.mrf.mxu1 }
 0x3a1   :  { %v1834_v51 = vmax.f32 %v1829_v55, 0.0 }
 0x3a2   :  { %v1831_v20 = vpop.f32.mrf.mxu1 }
 0x3a3   :  { %v1835_v61 = vpack.c.bf16 %v1834_v51, %v1834_v51 }
 0x3a4   :  { %v2327_v62 = vpop.f32.mrf.mxu1 }
 0x3a5   :  { %2337 = vmatmul.mubr.msk.bf16.vlgmr.msra.gmra.mxu1 %vm1343_vm2, %v1835_v61 }
 0x465   :  { %v1910_v26 = vpop.f32.mrf.mxu1 }
 0x466   :  { %v1911_v2 = vadd.f32 %v2076_v19, %v1910_v26 }
 0x467   :  { %v2338_v1 = vpop.f32.mrf.mxu1 }
 0x468   :  { %1917 = vst.msk [vmem:[#allocation2] sm:$0x3] %vm1916_vm5, %v1911_v2 }
 0x469   :  { %v1913_v0 = vpop.f32.mrf.mxu1 }
 0x46a   :  { %2440 = shalt.err (!%p2437_p4)
}
 0x46b   :  { %1927 = dma.vmem_to_hbm [thread:$0]  %s1925_s23, 32, %s3185_s4, [#allocation3]   ;;  %v2339_v8 = vpop.f32.mrf.mxu1 }
 0x46c   :  { %2449 = dma.done.wait [#allocation3], 32  }
 0x46d   :  { %2450 = vsyncadd [#allocation3], 4294967264 }
 0x46e   :  { %1931 = vsyncpa [#allocation3], 1 }

</bundles_post_ra>
